<compile_context>
chip_gen: v6e
topology: v6e:2x2x1
jax: 0.10.0
libtpu: 0.0.40
codegen_flags: <defaults>
</compile_context>

<pallas_src>
import jax
import jax.numpy as jnp
from jax.experimental import pallas as pl
from jax.experimental.pallas import tpu as pltpu


def _clipped_relu_kernel(x_ref, o_ref):
    # Elementwise hot path: two VPU ops (max, min), fully hidden under the DMA
    # stream. No MXU / transcendental work needed.
    x = x_ref[...]
    o_ref[...] = jnp.minimum(jnp.maximum(x, 0.0), 1.0)


def clipped_relu(x, *, block_rows=256, row_width=2048):
    """y = clamp(x, 0, 1) as a lane-dense, HBM-bound Pallas TPU streaming kernel.

    Works on arbitrary-rank float inputs by flattening to a lane-dense 2D view;
    the clamp itself happens in the Pallas kernel.
    """
    orig_shape = x.shape
    orig_dtype = x.dtype
    total = x.size

    # Flatten to 1D -- reshape of a contiguous array, no HBM traffic.
    x1 = x.reshape(-1)

    # Lane-dense row width: a large multiple of 128 (shrunk for tiny inputs so
    # the flat tail pad stays negligible).
    if total < row_width:
        row_width = ((total + 127) // 128) * 128

    # Only the flat tail (< row_width elements) ever needs padding; typical
    # NNUE shapes (batch * features a multiple of the row width) pad nothing,
    # so there is no extra HBM copy on the hot path.
    pad = (-total) % row_width
    if pad:
        x1 = jnp.pad(x1, (0, pad))

    rows = x1.size // row_width
    x2 = x1.reshape(rows, row_width)

    # Block row count: a multiple of 8 for big inputs, or the full row count
    # for small ones (both satisfy the (8, 128) BlockSpec rule).
    tile_m = block_rows if rows >= block_rows else rows
    grid = (pl.cdiv(rows, tile_m),)  # ragged last block handled by Pallas

    out = pl.pallas_call(
        _clipped_relu_kernel,
        out_shape=jax.ShapeDtypeStruct((rows, row_width), orig_dtype),
        grid_spec=pltpu.PrefetchScalarGridSpec(
            num_scalar_prefetch=0,
            grid=grid,
            in_specs=[pl.BlockSpec((tile_m, row_width), lambda i: (i, 0))],
            out_specs=pl.BlockSpec((tile_m, row_width), lambda i: (i, 0)),
        ),
        compiler_params=pltpu.CompilerParams(
            dimension_semantics=("parallel",),
        ),
    )(x2)

    out_flat = out.reshape(-1)
    if pad:
        out_flat = out_flat[:total]
    return out_flat.reshape(orig_shape)


if __name__ == "__main__":
    key = jax.random.PRNGKey(0)
    k_small, k_big = jax.random.split(key)

    # Small NNUE-ish activation tensor: (batch=2, hidden=32); values spread so
    # both clipping bounds are exercised.
    x_small = jax.random.normal(k_small, (2, 32), dtype=jnp.float32) * 2.0
    y_small = jax.block_until_ready(clipped_relu(x_small))
    assert y_small.shape == x_small.shape and y_small.dtype == x_small.dtype
    assert jnp.allclose(y_small, jnp.clip(x_small, 0.0, 1.0)), "small case mismatch"

    # Larger case exercising the multi-block streaming path, including a
    # ragged last row-block (2048*544 elems -> 544 rows of 2048, 3 grid steps
    # of 256 rows each, last one partial).
    x_big = jax.random.normal(k_big, (2048, 544), dtype=jnp.float32) * 2.0
    y_big = jax.block_until_ready(clipped_relu(x_big))
    assert y_big.shape == x_big.shape and y_big.dtype == x_big.dtype
    assert jnp.allclose(y_big, jnp.clip(x_big, 0.0, 1.0)), "big case mismatch"

    print("KERNEL_OK")
</pallas_src>

<mosaic_0001>
module attributes {stable_mosaic.version = 11 : i64} {
  func.func @_clipped_relu_kernel(%arg0: i32, %arg1: memref<1x128xf32, #tpu.memory_space<vmem>>, %arg2: memref<1x128xf32, #tpu.memory_space<vmem>>) attributes {dimension_semantics = [#tpu.dimension_semantics<parallel>], iteration_bounds = array<i64: 1>, scalar_prefetch = 0 : i64, scratch_operands = 0 : i64, tpu.core_type = #tpu.core_type<tc>, window_params = [{transform_indices = @transform_0, window_bounds = array<i64: 1, 128>}, {transform_indices = @transform_1, window_bounds = array<i64: 1, 128>}]} {
    %c0 = arith.constant 0 : index
    %c0_0 = arith.constant 0 : index
    %0 = vector.load %arg1[%c0, %c0_0] : memref<1x128xf32, #tpu.memory_space<vmem>>, vector<1x128xf32>
    %cst = arith.constant 0.000000e+00 : f32
    %1 = vector.broadcast %cst : f32 to vector<1x128xf32>
    %2 = arith.maximumf %0, %1 : vector<1x128xf32>
    %cst_1 = arith.constant 1.000000e+00 : f32
    %3 = vector.broadcast %cst_1 : f32 to vector<1x128xf32>
    %4 = arith.minimumf %2, %3 : vector<1x128xf32>
    %c0_2 = arith.constant 0 : index
    %c0_3 = arith.constant 0 : index
    %5 = vector.load %arg2[%c0_2, %c0_3] : memref<1x128xf32, #tpu.memory_space<vmem>>, vector<1x128xf32>
    tpu.vector_store %arg2[%c0_2, %c0_3], %4 {strides = array<i32>} : memref<1x128xf32, #tpu.memory_space<vmem>>, vector<1x128xf32>,
    return
  }
  func.func @transform_0(%arg0: i32) -> (i32, i32) {
    %c0_i32 = arith.constant 0 : i32
    %c0_i32_0 = arith.constant 0 : i32
    return %arg0, %c0_i32 : i32, i32
  }
  func.func @transform_1(%arg0: i32) -> (i32, i32) {
    %c0_i32 = arith.constant 0 : i32
    %c0_i32_0 = arith.constant 0 : i32
    return %arg0, %c0_i32 : i32, i32
  }
}

</mosaic_0001>

<bundles_post_ra>
// kernel: tpu_custom_call.1
= control target key start
LH: loop header
LB: loop body
LE: loop exit
PB: predicated region body
PF: predicated region fallthrough
CT: control target
= control target key end

     0   :  { %6 = vsyncpa [#allocation3], 0  ;;  %s104_s0 = inlined_call_operand.hbm [shape: f32[1,128], index: 0, kind: input, shape index: {}]   ;;  %s105_s1 = inlined_call_operand.hbm [shape: f32[1,128], index: 1, kind: output, shape index: {}]  }
   0x1   :  { %7 = vsyncpa [#allocation4], 0  ;;  %s86_s6 = smov [#allocation2]  }
   0x2   :  { %s14_s7 = sshll.u32 %s86_s6, 4  ;;  %s15_s7 = int_to_ptr.vmem [resolvable:$true] %s14_s7 }
   0x3   :  { %s50_s8 = scalar_lea.vmem %s15_s7, 16  ;;  %s54_s9 = scalar_lea.vmem %s15_s7, 32 }
   0x4   :  { %p51_p0 = scmp.ne.s32.totalorder %s15_s7, %s50_s8  ;;  %p55_p1 = scmp.lt.s32.totalorder %s15_s7, %s15_s7 }
   0x5   :  { %p56_p2 = scmp.lt.s32.totalorder %s54_s9, %s50_s8 }
   0x7   :  { %p57_p3 = por %p56_p2, %p55_p1 }
   0x9   :  { %p58_p4 = pnand %p57_p3, %p51_p0 }
   0xb   :  { %61 = shalt.err (!%p58_p4)
}
   0xc   :  { %17 = dma.hbm_to_vmem [thread:$0]  %s104_s0, 16, %s15_s7, [#allocation3]  }
   0xd   :  { %82 = dma.done.wait [#allocation3], 16  }
   0xe   :  { %83 = vsyncadd [#allocation3], 4294967280  ;;  %v21_v0 = vld [vmem:[#allocation2] sm:$0x1]  ;;  %s87_s12 = smov [#allocation5]  }
   0xf   :  { %s31_s13 = sshll.u32 %s87_s12, 4  ;;  %v22_v1 = vmax.f32 %v21_v0, 0.0  ;;  %s32_s13 = int_to_ptr.vmem [resolvable:$true] %s31_s13 }
  0x10   :  { %s62_s14 = scalar_lea.vmem %s32_s13, 16  ;;  %s66_s15 = scalar_lea.vmem %s32_s13, 32 }
  0x11   :  { %v23_v2 = vmin.f32 %v22_v1, 1.0  ;;  %p63_p5 = scmp.ne.s32.totalorder %s32_s13, %s62_s14  ;;  %p67_p6 = scmp.lt.s32.totalorder %s32_s13, %s32_s13 }
  0x12   :  { %p68_p7 = scmp.lt.s32.totalorder %s66_s15, %s62_s14 }
  0x13   :  { %24 = vst [vmem:[#allocation5] sm:$0x1] %v23_v2 }
  0x14   :  { %p69_p8 = por %p68_p7, %p67_p6 }
  0x16   :  { %p70_p9 = pnand %p69_p8, %p63_p5 }
  0x18   :  { %73 = shalt.err (!%p70_p9)
}
  0x19   :  { %34 = dma.vmem_to_hbm [thread:$0]  %s32_s13, 16, %s105_s1, [#allocation4]  }
  0x1a   :  { %84 = dma.done.wait [#allocation4], 16  }
  0x1b   :  { %85 = vsyncadd [#allocation4], 4294967280 }
  0x1c   :  { %38 = vsyncpa [#allocation3], 1 }
  0x1d   :  { %39 = vsyncpa [#allocation4], 1 }

</bundles_post_ra>
